<compile_context>
chip_gen: v7x
topology: tpu7x:2x2x1
jax: 0.10.0
libtpu: 0.0.40
codegen_flags: <defaults>
</compile_context>

<pallas_src>
import functools

import jax
import jax.numpy as jnp
from jax import lax
from jax.experimental import pallas as pl
from jax.experimental.pallas import tpu as pltpu

LANES = 128            # vreg lane width
ACC_ROWS = 32          # accumulator rows: 4 independent (8,128) vreg chains
NUM_CORES = 2          # megacore split on v7x; cheap masked duplicate elsewhere
MAX_TILE_ROWS = 8192   # per-block DMA tile: 4 MiB f32 + 1 MiB i8, double buffered
MAX_CHUNK_ROWS = 1024  # compute-chunk rows: bounds live f32 temps to ~0.5 MiB

DEFAULT_GAMMA = 2.0
DEFAULT_EPS = 1e-8


def _round_up(x, m):
    return ((x + m - 1) // m) * m


def _make_focal_kernel(gamma, eps, n_valid, tile_rows, chunk_rows,
                       num_blocks, blocks_per_core):
    gamma = float(gamma)
    eps = float(eps)
    tile_elems = tile_rows * LANES
    chunk_elems = chunk_rows * LANES
    n_chunks = tile_rows // chunk_rows
    # Every grid step maps to a distinct, completely full block -> no masking
    # code needs to be emitted at all.
    aligned = (NUM_CORES * blocks_per_core == num_blocks
               and num_blocks * tile_elems == n_valid)

    def focal_chunk(pred, lab_i8):
        pred = pred.astype(jnp.float32)
        # The i8->f32 convert also serves as the mask-layout promotion for the
        # selects below, so an integer-domain compare would not be cheaper.
        is_pos = lab_i8.astype(jnp.float32) > 0.0
        p1 = pred + eps
        # NOT folded to (1+eps)-pred: 1 + 1e-8 rounds to 1.0 in f32, which
        # would drop the eps floor the reference relies on at pred == 1.
        p0 = (1.0 - pred) + eps
        pow_arg = jnp.where(is_pos, p0, p1)   # base raised to gamma
        log_arg = jnp.where(is_pos, p1, p0)   # one log2 per element
        if gamma == 2.0:
            powed = pow_arg * pow_arg         # avoid exp/log pow lowering
        elif gamma == 1.0:
            powed = pow_arg
        elif gamma == 0.0:
            powed = jnp.ones_like(pow_arg)
        else:
            # Safe because p0, p1 >= eps > 0 for real elements (pred in [0,1],
            # matching the reference); masked tail elements may be NaN but are
            # select-ed away before accumulation.
            powed = pow_arg ** gamma
        return powed * jnp.log2(log_arg)

    def kernel(pred_ref, lab_ref, out_ref):
        c = pl.program_id(0)
        i = pl.program_id(1)
        g = c * blocks_per_core + i            # global row-block index

        @pl.when(i == 0)
        def _init():
            out_ref[...] = jnp.zeros_like(out_ref)

        def accumulate(j, mask_fn=None):
            r0 = pl.multiple_of(j * chunk_rows, chunk_rows)
            focal = focal_chunk(pred_ref[pl.ds(r0, chunk_rows), :],
                                lab_ref[pl.ds(r0, chunk_rows), :])
            if mask_fn is not None:
                focal = mask_fn(j, focal)
            # (chunk_rows, 128) -> (32, 128): four independent (8,128) vreg
            # accumulation chains (VPU only; no XLU funnel, no scalar RMW).
            out_ref[...] += focal.reshape(
                chunk_rows // ACC_ROWS, ACC_ROWS, LANES).sum(axis=0)

        if aligned:
            @pl.loop(0, n_chunks)
            def _all_full(j):
                accumulate(j)
        else:
            # Only the last real block (and any clamped duplicate block when
            # num_blocks % NUM_CORES != 0) pays the masking cost.
            @pl.when(g < num_blocks - 1)
            def _full_blocks():
                @pl.loop(0, n_chunks)
                def _(j):
                    accumulate(j)

            @pl.when(g >= num_blocks - 1)
            def _tail_block():
                # Per-chunk element ids, hoisted out of the chunk loop.
                idx = (lax.broadcasted_iota(jnp.int32, (chunk_rows, LANES), 0)
                       * LANES
                       + lax.broadcasted_iota(jnp.int32, (chunk_rows, LANES), 1))
                base = g * tile_elems          # int32: assumes n < 2**31

                def mask_fn(j, focal):
                    rem = (n_valid - base) - j * chunk_elems
                    # rem <= 0 -> everything masked (clamped duplicate block).
                    return jnp.where(idx < rem, focal, 0.0)

                @pl.loop(0, n_chunks)
                def _(j):
                    accumulate(j, mask_fn)

    return kernel


def _focal_partial_sums(pred2d, lab2d, *, gamma, eps, n_valid, tile_rows,
                        chunk_rows, num_blocks, blocks_per_core):
    last_block = num_blocks - 1

    def in_map(c, i):
        # Clamp so trailing duplicate grid steps (num_blocks not a multiple of
        # NUM_CORES) re-read the last real block; the kernel masks their
        # contribution to exactly zero.
        return (jnp.minimum(c * blocks_per_core + i, last_block), 0)

    kernel = _make_focal_kernel(gamma, eps, n_valid, tile_rows, chunk_rows,
                                num_blocks, blocks_per_core)
    return pl.pallas_call(
        kernel,
        out_shape=jax.ShapeDtypeStruct((NUM_CORES * ACC_ROWS, LANES),
                                       jnp.float32),
        grid_spec=pltpu.PrefetchScalarGridSpec(
            num_scalar_prefetch=0,
            grid=(NUM_CORES, blocks_per_core),
            in_specs=[pl.BlockSpec((tile_rows, LANES), in_map),
                      pl.BlockSpec((tile_rows, LANES), in_map)],
            out_specs=pl.BlockSpec((ACC_ROWS, LANES), lambda c, i: (c, 0)),
        ),
        compiler_params=pltpu.CompilerParams(
            dimension_semantics=("parallel", "arbitrary"),
            vmem_limit_bytes=32 * 1024 * 1024,   # <= physical on v5e/v6e/v7x
        ),
    )(pred2d, lab2d)


@functools.partial(jax.jit, static_argnames=("gamma", "eps"))
def focal_loss(pred, label, gamma=DEFAULT_GAMMA, eps=DEFAULT_EPS):
    """Replicates FocalLoss(gamma, eps).forward(pred, label) -> scalar loss."""
    n = pred.size

    # Stream the label as int8 (1 B/elem).  uint8 is a free bitcast; bool uses
    # one astype (fuses with the label producer under an end-to-end jit).
    if label.dtype == jnp.uint8:
        label = lax.bitcast_convert_type(label, jnp.int8)
    elif label.dtype != jnp.int8:
        label = label.astype(jnp.int8)

    pred_flat = pred.reshape(-1)
    lab_flat = label.reshape(-1)

    lane_tail = n % LANES
    if lane_tail:
        # Only lane-ragged sizes pay a pad copy (needed for the (rows, 128)
        # reshape).  Pad values are masked in-kernel, so 0 is fine.
        pad = LANES - lane_tail
        pred_flat = jnp.pad(pred_flat, (0, pad))
        lab_flat = jnp.pad(lab_flat, (0, pad))
    rows = pred_flat.size // LANES

    pred2d = pred_flat.reshape(rows, LANES)
    lab2d = lab_flat.reshape(rows, LANES)

    # Block sizing decoupled from any padding: the last (partial) block and
    # any duplicate block are masked in-kernel instead of padded.
    tile_rows = min(MAX_TILE_ROWS,
                    _round_up(pl.cdiv(rows, NUM_CORES), ACC_ROWS))
    chunk_rows = min(MAX_CHUNK_ROWS, tile_rows)
    tile_rows = _round_up(tile_rows, chunk_rows)
    num_blocks = pl.cdiv(rows, tile_rows)
    blocks_per_core = pl.cdiv(num_blocks, NUM_CORES)

    partials = _focal_partial_sums(
        pred2d, lab2d, gamma=float(gamma), eps=float(eps), n_valid=n,
        tile_rows=tile_rows, chunk_rows=chunk_rows,
        num_blocks=num_blocks, blocks_per_core=blocks_per_core)
    # Tiny scalar epilogue in plain JAX: cross-lane/core sum, mean, negate.
    # (f32 accumulation; expect ~1e-6 relative drift vs. a pairwise reference
    # for very large N.)
    return -jnp.sum(partials) / jnp.float32(n)


def _reference_focal_loss(pred, label, gamma=DEFAULT_GAMMA, eps=DEFAULT_EPS):
    lab = label.astype(jnp.float32)
    p0, p1 = 1.0 - pred + eps, pred + eps
    focal = (p1 ** gamma) * jnp.log2(p0) * (1.0 - lab) \
          + (p0 ** gamma) * jnp.log2(p1) * lab
    return -jnp.mean(focal)


if __name__ == "__main__":
    key = jax.random.PRNGKey(0)
    k1, k2, k3, k4, k5, k6 = jax.random.split(key, 6)

    # NCHW inputs, matching the BiLoss usage of FocalLoss.
    B, C, H, W = 2, 4, 16, 16
    pred = jax.random.uniform(k1, (B, C, H, W), dtype=jnp.float32)   # in (0, 1)
    label = jax.random.uniform(k2, (B, C, H, W)) > 0.7               # bool labels

    loss = focal_loss(pred, label, gamma=2.0, eps=1e-8)
    jax.block_until_ready(loss)
    ref = _reference_focal_loss(pred, label, gamma=2.0, eps=1e-8)
    assert jnp.allclose(loss, ref, rtol=1e-4, atol=1e-6), (loss, ref)

    # Ragged size (not a multiple of 128) exercises the lane-pad + mask path.
    pred2 = jax.random.uniform(k3, (3, 5, 7, 11), dtype=jnp.float32)
    label2 = jax.random.uniform(k4, (3, 5, 7, 11)) > 0.5
    loss2 = focal_loss(pred2, label2, gamma=2.0, eps=1e-8)
    jax.block_until_ready(loss2)
    ref2 = _reference_focal_loss(pred2, label2, gamma=2.0, eps=1e-8)
    assert jnp.allclose(loss2, ref2, rtol=1e-4, atol=1e-6), (loss2, ref2)

    # 128-aligned but tile-ragged size: exercises the zero-copy path, the
    # multi-chunk inner loop, a full block on core 0 and a masked tail block
    # (including a fully-masked chunk) on core 1.
    pred3 = jax.random.uniform(k5, (2, 8, 128, 160), dtype=jnp.float32)
    label3 = jax.random.uniform(k6, (2, 8, 128, 160)) > 0.3
    loss3 = focal_loss(pred3, label3, gamma=2.0, eps=1e-8)
    jax.block_until_ready(loss3)
    ref3 = _reference_focal_loss(pred3, label3, gamma=2.0, eps=1e-8)
    assert jnp.allclose(loss3, ref3, rtol=1e-4, atol=1e-6), (loss3, ref3)

    print("KERNEL_OK")
</pallas_src>

<mosaic_0001>
module attributes {stable_mosaic.version = 11 : i64} {
  func.func @kernel(%arg0: i32, %arg1: i32, %arg2: memref<32x128xf32, #tpu.memory_space<vmem>>, %arg3: memref<32x128xi8, #tpu.memory_space<vmem>>, %arg4: memref<32x128xf32, #tpu.memory_space<vmem>>) attributes {dimension_semantics = [#tpu.dimension_semantics<parallel>, #tpu.dimension_semantics<arbitrary>], iteration_bounds = array<i64: 2, 1>, scalar_prefetch = 0 : i64, scratch_operands = 0 : i64, tpu.core_type = #tpu.core_type<tc>, window_params = [{transform_indices = @transform_0, window_bounds = array<i64: 32, 128>}, {transform_indices = @transform_1, window_bounds = array<i64: 32, 128>}, {transform_indices = @transform_2, window_bounds = array<i64: 32, 128>}]} {
    %c1_i32 = arith.constant 1 : i32
    %0 = arith.muli %arg0, %c1_i32 : i32
    %1 = arith.addi %0, %arg1 : i32
    %c0_i32 = arith.constant 0 : i32
    %2 = arith.cmpi eq, %arg1, %c0_i32 : i32
    %3 = arith.extui %2 : i1 to i32
    %c0_i32_0 = arith.constant 0 : i32
    %4 = arith.cmpi ne, %3, %c0_i32_0 : i32
    scf.if %4 {
      %cst = arith.constant 0.000000e+00 : f32
      %11 = vector.broadcast %cst : f32 to vector<32x128xf32>
      %c0 = arith.constant 0 : index
      %c0_5 = arith.constant 0 : index
      %12 = vector.load %arg4[%c0, %c0_5] : memref<32x128xf32, #tpu.memory_space<vmem>>, vector<32x128xf32>
      tpu.vector_store %arg4[%c0, %c0_5], %11 {strides = array<i32>} : memref<32x128xf32, #tpu.memory_space<vmem>>, vector<32x128xf32>,
    } else {
    }
    %c0_i32_1 = arith.constant 0 : i32
    %5 = arith.cmpi slt, %1, %c0_i32_1 : i32
    %6 = arith.extui %5 : i1 to i32
    %c0_i32_2 = arith.constant 0 : i32
    %7 = arith.cmpi ne, %6, %c0_i32_2 : i32
    scf.if %7 {
      %c0_i32_5 = arith.constant 0 : i32
      %c1_i32_6 = arith.constant 1 : i32
      %11 = arith.muli %c0_i32_5, %c1_i32_6 : i32
      %c0_i32_7 = arith.constant 0 : i32
      %12 = arith.addi %c0_i32_7, %11 : i32
      %c32_i32 = arith.constant 32 : i32
      %13 = arith.muli %12, %c32_i32 : i32
      %14 = tpu.assume_multiple %13, 32 : i32
      %15 = arith.index_cast %14 : i32 to index
      %c0 = arith.constant 0 : index
      %16 = vector.load %arg2[%15, %c0] : memref<32x128xf32, #tpu.memory_space<vmem>>, vector<32x128xf32>
      %17 = arith.index_cast %14 : i32 to index
      %c0_8 = arith.constant 0 : index
      %18 = vector.load %arg3[%17, %c0_8] : memref<32x128xi8, #tpu.memory_space<vmem>>, vector<32x128xi8>
      %19 = arith.sitofp %18 : vector<32x128xi8> to vector<32x128xf32>
      %cst = arith.constant 0.000000e+00 : f32
      %20 = vector.broadcast %cst : f32 to vector<32x128xf32>
      %21 = arith.cmpf ogt, %19, %20 : vector<32x128xf32>
      %cst_9 = arith.constant 9.99999993E-9 : f32
      %22 = vector.broadcast %cst_9 : f32 to vector<32x128xf32>
      %23 = arith.addf %16, %22 : vector<32x128xf32>
      %cst_10 = arith.constant 1.000000e+00 : f32
      %24 = vector.broadcast %cst_10 : f32 to vector<32x128xf32>
      %25 = arith.subf %24, %16 : vector<32x128xf32>
      %cst_11 = arith.constant 9.99999993E-9 : f32
      %26 = vector.broadcast %cst_11 : f32 to vector<32x128xf32>
      %27 = arith.addf %25, %26 : vector<32x128xf32>
      %28 = arith.select %21, %27, %23 : vector<32x128xi1>, vector<32x128xf32>
      %29 = arith.select %21, %23, %27 : vector<32x128xi1>, vector<32x128xf32>
      %30 = arith.mulf %28, %28 : vector<32x128xf32>
      %31 = math.log %29 : vector<32x128xf32>
      %cst_12 = arith.constant 2.000000e+00 : f32
      %32 = math.log %cst_12 : f32
      %33 = vector.broadcast %32 : f32 to vector<32x128xf32>
      %34 = arith.divf %31, %33 : vector<32x128xf32>
      %35 = arith.mulf %30, %34 : vector<32x128xf32>
      %c0_13 = arith.constant 0 : index
      %c0_14 = arith.constant 0 : index
      %36 = vector.load %arg4[%c0_13, %c0_14] : memref<32x128xf32, #tpu.memory_space<vmem>>, vector<32x128xf32>
      %37 = vector.shape_cast %35 : vector<32x128xf32> to vector<1x32x128xf32>
      %cst_15 = arith.constant dense<0.000000e+00> : vector<32x128xf32>
      %38 = vector.multi_reduction <add>, %37, %cst_15 [0] : vector<1x32x128xf32> to vector<32x128xf32>
      %39 = arith.addf %36, %38 : vector<32x128xf32>
      %c0_16 = arith.constant 0 : index
      %c0_17 = arith.constant 0 : index
      %40 = vector.load %arg4[%c0_16, %c0_17] : memref<32x128xf32, #tpu.memory_space<vmem>>, vector<32x128xf32>
      tpu.vector_store %arg4[%c0_16, %c0_17], %39 {strides = array<i32>} : memref<32x128xf32, #tpu.memory_space<vmem>>, vector<32x128xf32>,
      %c1_i32_18 = arith.constant 1 : i32
    } else {
    }
    %c0_i32_3 = arith.constant 0 : i32
    %8 = arith.cmpi sge, %1, %c0_i32_3 : i32
    %9 = arith.extui %8 : i1 to i32
    %c0_i32_4 = arith.constant 0 : i32
    %10 = arith.cmpi ne, %9, %c0_i32_4 : i32
    scf.if %10 {
      %11 = tpu.iota {dimensions = array<i32: 0>} : vector<32x128xi32>
      %c128_i32 = arith.constant 128 : i32
      %12 = vector.broadcast %c128_i32 : i32 to vector<32x128xi32>
      %13 = arith.muli %11, %12 : vector<32x128xi32>
      %14 = tpu.iota {dimensions = array<i32: 1>} : vector<32x128xi32>
      %15 = arith.addi %13, %14 : vector<32x128xi32>
      %c4096_i32 = arith.constant 4096 : i32
      %16 = arith.muli %1, %c4096_i32 : i32
      %c0_i32_5 = arith.constant 0 : i32
      %c1_i32_6 = arith.constant 1 : i32
      %17 = arith.muli %c0_i32_5, %c1_i32_6 : i32
      %c0_i32_7 = arith.constant 0 : i32
      %18 = arith.addi %c0_i32_7, %17 : i32
      %c32_i32 = arith.constant 32 : i32
      %19 = arith.muli %18, %c32_i32 : i32
      %20 = tpu.assume_multiple %19, 32 : i32
      %21 = arith.index_cast %20 : i32 to index
      %c0 = arith.constant 0 : index
      %22 = vector.load %arg2[%21, %c0] : memref<32x128xf32, #tpu.memory_space<vmem>>, vector<32x128xf32>
      %23 = arith.index_cast %20 : i32 to index
      %c0_8 = arith.constant 0 : index
      %24 = vector.load %arg3[%23, %c0_8] : memref<32x128xi8, #tpu.memory_space<vmem>>, vector<32x128xi8>
      %25 = arith.sitofp %24 : vector<32x128xi8> to vector<32x128xf32>
      %cst = arith.constant 0.000000e+00 : f32
      %26 = vector.broadcast %cst : f32 to vector<32x128xf32>
      %27 = arith.cmpf ogt, %25, %26 : vector<32x128xf32>
      %cst_9 = arith.constant 9.99999993E-9 : f32
      %28 = vector.broadcast %cst_9 : f32 to vector<32x128xf32>
      %29 = arith.addf %22, %28 : vector<32x128xf32>
      %cst_10 = arith.constant 1.000000e+00 : f32
      %30 = vector.broadcast %cst_10 : f32 to vector<32x128xf32>
      %31 = arith.subf %30, %22 : vector<32x128xf32>
      %cst_11 = arith.constant 9.99999993E-9 : f32
      %32 = vector.broadcast %cst_11 : f32 to vector<32x128xf32>
      %33 = arith.addf %31, %32 : vector<32x128xf32>
      %34 = arith.select %27, %33, %29 : vector<32x128xi1>, vector<32x128xf32>
      %35 = arith.select %27, %29, %33 : vector<32x128xi1>, vector<32x128xf32>
      %36 = arith.mulf %34, %34 : vector<32x128xf32>
      %37 = math.log %35 : vector<32x128xf32>
      %cst_12 = arith.constant 2.000000e+00 : f32
      %38 = math.log %cst_12 : f32
      %39 = vector.broadcast %38 : f32 to vector<32x128xf32>
      %40 = arith.divf %37, %39 : vector<32x128xf32>
      %41 = arith.mulf %36, %40 : vector<32x128xf32>
      %c2048_i32 = arith.constant 2048 : i32
      %42 = arith.subi %c2048_i32, %16 : i32
      %c4096_i32_13 = arith.constant 4096 : i32
      %43 = arith.muli %18, %c4096_i32_13 : i32
      %44 = arith.subi %42, %43 : i32
      %45 = vector.broadcast %44 : i32 to vector<32x128xi32>
      %46 = arith.cmpi slt, %15, %45 : vector<32x128xi32>
      %cst_14 = arith.constant 0.000000e+00 : f32
      %47 = vector.broadcast %cst_14 : f32 to vector<32x128xf32>
      %48 = arith.select %46, %41, %47 : vector<32x128xi1>, vector<32x128xf32>
      %c0_15 = arith.constant 0 : index
      %c0_16 = arith.constant 0 : index
      %49 = vector.load %arg4[%c0_15, %c0_16] : memref<32x128xf32, #tpu.memory_space<vmem>>, vector<32x128xf32>
      %50 = vector.shape_cast %48 : vector<32x128xf32> to vector<1x32x128xf32>
      %cst_17 = arith.constant dense<0.000000e+00> : vector<32x128xf32>
      %51 = vector.multi_reduction <add>, %50, %cst_17 [0] : vector<1x32x128xf32> to vector<32x128xf32>
      %52 = arith.addf %49, %51 : vector<32x128xf32>
      %c0_18 = arith.constant 0 : index
      %c0_19 = arith.constant 0 : index
      %53 = vector.load %arg4[%c0_18, %c0_19] : memref<32x128xf32, #tpu.memory_space<vmem>>, vector<32x128xf32>
      tpu.vector_store %arg4[%c0_18, %c0_19], %52 {strides = array<i32>} : memref<32x128xf32, #tpu.memory_space<vmem>>, vector<32x128xf32>,
      %c1_i32_20 = arith.constant 1 : i32
    } else {
    }
    return
  }
  func.func @transform_0(%arg0: i32, %arg1: i32) -> (i32, i32) {
    %c1_i32 = arith.constant 1 : i32
    %0 = arith.muli %arg0, %c1_i32 : i32
    %1 = arith.addi %0, %arg1 : i32
    %c0_i32 = arith.constant 0 : i32
    %2 = arith.minsi %1, %c0_i32 : i32
    %c0_i32_0 = arith.constant 0 : i32
    %c0_i32_1 = arith.constant 0 : i32
    return %2, %c0_i32_0 : i32, i32
  }
  func.func @transform_1(%arg0: i32, %arg1: i32) -> (i32, i32) {
    %c1_i32 = arith.constant 1 : i32
    %0 = arith.muli %arg0, %c1_i32 : i32
    %1 = arith.addi %0, %arg1 : i32
    %c0_i32 = arith.constant 0 : i32
    %2 = arith.minsi %1, %c0_i32 : i32
    %c0_i32_0 = arith.constant 0 : i32
    %c0_i32_1 = arith.constant 0 : i32
    return %2, %c0_i32_0 : i32, i32
  }
  func.func @transform_2(%arg0: i32, %arg1: i32) -> (i32, i32) {
    %c0_i32 = arith.constant 0 : i32
    %c0_i32_0 = arith.constant 0 : i32
    return %arg0, %c0_i32 : i32, i32
  }
}

</mosaic_0001>

<bundles_post_ra>
// kernel: focal_loss.1
= control target key start
LH: loop header
LB: loop body
LE: loop exit
PB: predicated region body
PF: predicated region fallthrough
CT: control target
= control target key end

     0   :  { %s632_s9 = smov 0   ;;  %s634_s10 = smov 0   ;;  %s729_s0 = inlined_call_operand.vmem [shape: f32[16,128], index: 0, kind: input, shape index: {}]   ;;  %s730_s1 = inlined_call_operand.vmem [shape: s8[16,128], index: 1, kind: input, shape index: {}]   ;;  %s731_s2 = inlined_call_operand.vmem [shape: f32[64,128], index: 2, kind: output, shape index: {}]  }
   0x1   :  { %s636_s11 = smov 0  }
   0x2 LB: > { %s24_s12 = sadd.s32 1, %s610_s10  ;;  %p521_p0 = scmp.ge.s32.totalorder %s614_s11, 1  ;;  %s614_s11 = sphi %s636_s11, %s12_s11   ;;  %s610_s10 = sphi %s634_s10, %s733_s10   ;;  %s606_s9 = sphi %s632_s9, %s732_s9  }
   0x3   : > { %p26_p1 = scmp.ge.s32.totalorder %s24_s12, 2  ;;  %p168_p2 = scmp.lt.s32.totalorder %s614_s11, 3 }
   0x5   : > { %s735_s12 = smov (%p26_p1, %s24_s12), 0  ;;  %p169_p3 = pnand %p521_p0, %p168_p2 }
   0x6   : > { %p206_p4 = scmp.lt.s32.totalorder (!%p169_p3), %s606_s9, 0  ;;  %s526_s13 = sshll.u32 (!%p169_p3), %s606_s9, 2  ;;  %v616_v0 = vmov (!%p169_p3), 0.0  }
   0x7   : > { %172 = sbr.rel (%p169_p3) target bundleno = 85 (0x55), region = 28  ;;  %p238_p5 = scmp.lt.s32.totalorder (!%p169_p3), %s526_s13, 7 }
   0x8   : > { %p528_p7 = scmp.ge.s32.totalorder (!%p169_p3), %s606_s9, 0 }
   0xe   : > { %s207_s14 = scalar_select %p206_p4, %s606_s9, 0 }
   0xf   : > { %s737_s13 = smov (!%p238_p5, %s526_s13), 7  ;;  %255 = sbr.rel (%p528_p7) target bundleno = 53 (0x35), region = 36 }
  0x10   : > { %s522_s15 = sshll.u32 %s207_s14, 2  ;;  %s527_s16 = sshll.u32 %s737_s13, 3 }
  0x11   : > { %p211_p6 = scmp.lt.s32.totalorder %s522_s15, 1  ;;  %s660_s19 = scalar_lea.vmem %s731_s2, %s527_s16 }
  0x12   : > { %248 = vst [vmem:[%s660_s19] sm:$0xff] %v616_v0  ;;  %249 = vst [vmem:[%s660_s19 + $0x8] sm:$0xff] %v616_v0 }
  0x13   : > { %s739_s15 = smov (!%p211_p6, %s522_s15), 1  ;;  %250 = vst [vmem:[%s660_s19 + $0x10] sm:$0xff] %v616_v0  ;;  %251 = vst [vmem:[%s660_s19 + $0x18] sm:$0xff] %v616_v0 }
  0x14   : > { %s523_s20 = sshll.u32 %s739_s15, 3  ;;  %s525_s21 = sshll.u32 %s739_s15, 1 }
  0x15   : > { %s668_s24 = scalar_lea.vmem %s729_s0, %s523_s20  ;;  %s673_s27 = scalar_lea.vmem %s730_s1, %s525_s21 }
  0x16   : > { %v256_v1 = vld [vmem:[%s668_s24] sm:$0xff]  ;;  %v257_v2 = vld [vmem:[%s668_s24 + $0x8] sm:$0xff]  ;;  %v258_v10 = vld [vmem:[%s668_s24 + $0x10] sm:$0xff] }
  0x17   : > { %v534_v3 = vld [vmem:[%s673_s27] sm:$0xff]   ;;  %v276_v6 = vadd.f32 1e-08, %v256_v1  ;;  %v277_v7 = vadd.f32 1e-08, %v257_v2  ;;  %v280_v8 = vsub.f32 1.0, %v256_v1 }
  0x18   : > { %v535_v4 = vunpack.c.0.s8 %v534_v3  ;;  %v536_v5 = vunpack.c.1.s8 %v534_v3  ;;  %v281_v9 = vsub.f32 1.0, %v257_v2  ;;  %v539_v11 = vunpack.c.2.s8 %v534_v3  ;;  %v259_v23 = vld [vmem:[%s668_s24 + $0x18] sm:$0xff] }
  0x19   : > { %v540_v12 = vunpack.c.3.s8 %v534_v3  ;;  %v282_v15 = vsub.f32 1.0, %v258_v10  ;;  %v284_v16 = vadd.f32 1e-08, %v280_v8  ;;  %v278_v19 = vadd.f32 1e-08, %v258_v10  ;;  %v317_v44 = vld [vmem:[%s660_s19] sm:$0xff] }
  0x1a   : > { %v268_v13 = vcvt.s32.f32 %v535_v4  ;;  %v269_v14 = vcvt.s32.f32 %v536_v5  ;;  %v285_v17 = vadd.f32 1e-08, %v281_v9  ;;  %v270_v18 = vcvt.s32.f32 %v539_v11  ;;  %v318_v46 = vld [vmem:[%s660_s19 + $0x8] sm:$0xff]  ;;  %v319_v50 = vld [vmem:[%s660_s19 + $0x10] sm:$0xff]  ;;  %v320_v51 = vld [vmem:[%s660_s19 + $0x18] sm:$0xff] }
  0x1b   : > { %v286_v20 = vadd.f32 1e-08, %v282_v15  ;;  %v271_v24 = vcvt.s32.f32 %v540_v12  ;;  %v279_v26 = vadd.f32 1e-08, %v259_v23  ;;  %v283_v27 = vsub.f32 1.0, %v259_v23 }
  0x1c   : > { %vm272_vm0 = vcmp.gt.f32.partialorder %v268_v13, 0.0  ;;  %vm273_vm1 = vcmp.gt.f32.partialorder %v269_v14, 0.0  ;;  %vm274_vm2 = vcmp.gt.f32.partialorder %v270_v18, 0.0 }
  0x1d   : > { %v292_v21 = vsel %vm272_vm0, %v276_v6, %v284_v16  ;;  %v293_v22 = vsel %vm273_vm1, %v277_v7, %v285_v17  ;;  %v294_v25 = vsel %vm274_vm2, %v278_v19, %v286_v20  ;;  %vm275_vm3 = vcmp.gt.f32.partialorder %v271_v24, 0.0 }
  0x1e   : > { %576 = vlog2.f32 %v292_v21  ;;  %v287_v28 = vadd.f32 1e-08, %v283_v27  ;;  %v288_v30 = vsel %vm272_vm0, %v284_v16, %v276_v6  ;;  %v289_v31 = vsel %vm273_vm1, %v285_v17, %v277_v7 }
  0x1f   : > { %578 = vlog2.f32 %v293_v22  ;;  %v290_v33 = vsel %vm274_vm2, %v286_v20, %v278_v19  ;;  %v296_v35 = vmul.f32 %v288_v30, %v288_v30  ;;  %v297_v38 = vmul.f32 %v289_v31, %v289_v31 }
  0x20   : > { %580 = vlog2.f32 %v294_v25  ;;  %v295_v29 = vsel %vm275_vm3, %v279_v26, %v287_v28  ;;  %v298_v41 = vmul.f32 %v290_v33, %v290_v33  ;;  %v291_v48 = vsel %vm275_vm3, %v287_v28, %v279_v26 }
  0x21   : > { %582 = vlog2.f32 %v295_v29  ;;  %v299_v56 = vmul.f32 %v291_v48, %v291_v48 }
  0x28   : > { %v577_v32 = vpop.eup %576 }
  0x29   : > { %v579_v34 = vpop.eup %578  ;;  %v301_v36 = vmul.f32 0.6931472, %v577_v32 }
  0x2a   : > { %v581_v37 = vpop.eup %580  ;;  %v303_v39 = vmul.f32 0.6931472, %v579_v34 }
  0x2b   : > { %v309_v40 = vmul.f32 1.442695, %v301_v36  ;;  %v305_v42 = vmul.f32 0.6931472, %v581_v37  ;;  %v583_v52 = vpop.eup %582 }
  0x2c   : > { %v310_v43 = vmul.f32 1.442695, %v303_v39  ;;  %v307_v57 = vmul.f32 0.6931472, %v583_v52 }
  0x2d   : > { %v313_v45 = vmul.f32 %v309_v40, %v296_v35  ;;  %v311_v47 = vmul.f32 1.442695, %v305_v42 }
  0x2e   : > { %v314_v49 = vmul.f32 %v310_v43, %v297_v38  ;;  %v312_v59 = vmul.f32 1.442695, %v307_v57 }
  0x2f   : > { %v325_v53 = vadd.f32 %v317_v44, %v313_v45  ;;  %v315_v54 = vmul.f32 %v311_v47, %v298_v41 }
  0x30   : > { %v326_v55 = vadd.f32 %v318_v46, %v314_v49  ;;  %v316_v60 = vmul.f32 %v312_v59, %v299_v56 }
  0x31   : > { %329 = vst [vmem:[%s660_s19] sm:$0xff] %v325_v53  ;;  %v327_v58 = vadd.f32 %v319_v50, %v315_v54 }
  0x32   : > { %330 = vst [vmem:[%s660_s19 + $0x8] sm:$0xff] %v326_v55  ;;  %v328_v61 = vadd.f32 %v320_v51, %v316_v60 }
  0x33   : > { %331 = vst [vmem:[%s660_s19 + $0x10] sm:$0xff] %v327_v58 }
  0x34   : > { %332 = vst [vmem:[%s660_s19 + $0x18] sm:$0xff] %v328_v61 }
  0x35 PF: > { %336 = sbr.rel (%p206_p4) target bundleno = 85 (0x55), region = 40  ;;  %v353_v62 = vld [vmem:[%s668_s24] sm:$0xff] (!%p206_p4)  ;;  %v354_v63 = vld [vmem:[%s668_s24 + $0x8] sm:$0xff] (!%p206_p4)  ;;  %v337_v3 = vlaneseq (!%p206_p4)  ;;  %v355_v13 = vld [vmem:[%s668_s24 + $0x10] sm:$0xff] (!%p206_p4)  ;;  %s530_s28 = sshll.u32 (!%p206_p4), %s606_s9, 12 }
  0x36   : > { %v542_v0 = vld [vmem:[%s673_s27] sm:$0xff] (!%p206_p4)   ;;  %v373_v4 = vadd.f32 (!%p206_p4), 1e-08, %v353_v62  ;;  %v377_v5 = vsub.f32 (!%p206_p4), 1.0, %v353_v62  ;;  %v378_v6 = vsub.f32 (!%p206_p4), 1.0, %v354_v63  ;;  %v356_v18 = vld [vmem:[%s668_s24 + $0x18] sm:$0xff] (!%p206_p4) }
  0x37   : > { %v543_v1 = vunpack.c.0.s8 (!%p206_p4), %v542_v0  ;;  %v544_v2 = vunpack.c.1.s8 (!%p206_p4), %v542_v0  ;;  %v374_v9 = vadd.f32 (!%p206_p4), 1e-08, %v354_v63  ;;  %v547_v10 = vunpack.c.2.s8 (!%p206_p4), %v542_v0  ;;  %s414_s29 = ssub.s32 (!%p206_p4), 2048, %s530_s28 }
  0x38   : > { %v381_v11 = vadd.f32 (!%p206_p4), 1e-08, %v377_v5  ;;  %v382_v12 = vadd.f32 (!%p206_p4), 1e-08, %v378_v6  ;;  %v338_v15 = vshrl.u32 (!%p206_p4), %v337_v3, 7  ;;  %v379_v20 = vsub.f32 (!%p206_p4), 1.0, %v355_v13 }
  0x39   : > { %v365_v7 = vcvt.s32.f32 (!%p206_p4), %v543_v1  ;;  %v366_v8 = vcvt.s32.f32 (!%p206_p4), %v544_v2  ;;  %v367_v14 = vcvt.s32.f32 (!%p206_p4), %v547_v10  ;;  %v375_v19 = vadd.f32 (!%p206_p4), 1e-08, %v355_v13  ;;  %v424_v52 = vld [vmem:[%s660_s19] sm:$0xff] (!%p206_p4)  ;;  %v425_v55 = vld [vmem:[%s660_s19 + $0x8] sm:$0xff] (!%p206_p4) }
  0x3a   : > { %v548_v21 = vunpack.c.3.s8 (!%p206_p4), %v542_v0  ;;  %v339_v22 = vadd.s32 (!%p206_p4), 8, %v338_v15  ;;  %v383_v23 = vadd.f32 (!%p206_p4), 1e-08, %v379_v20  ;;  %v376_v24 = vadd.f32 (!%p206_p4), 1e-08, %v356_v18  ;;  %v426_v59 = vld [vmem:[%s660_s19 + $0x10] sm:$0xff] (!%p206_p4) }
  0x3b   : > { %vm369_vm4 = vcmp.gt.f32.partialorder (!%p206_p4), %v365_v7, 0.0  ;;  %vm370_vm5 = vcmp.gt.f32.partialorder (!%p206_p4), %v366_v8, 0.0  ;;  %vm371_vm6 = vcmp.gt.f32.partialorder (!%p206_p4), %v367_v14, 0.0  ;;  %v380_v25 = vsub.f32 (!%p206_p4), 1.0, %v356_v18  ;;  %v427_v60 = vld [vmem:[%s660_s19 + $0x18] sm:$0xff] (!%p206_p4) }
  0x3c   : > { %v389_v16 = vsel %vm369_vm4, %v373_v4, %v381_v11  ;;  %v390_v17 = vsel %vm370_vm5, %v374_v9, %v382_v12  ;;  %v368_v26 = vcvt.s32.f32 %v548_v21  ;;  %v391_v27 = vsel %vm371_vm6, %v375_v19, %v383_v23 }
  0x3d   : > { %584 = vlog2.f32 %v389_v16  ;;  %v384_v28 = vadd.f32 1e-08, %v380_v25  ;;  %v342_v29 = vmul.u32 128, %v338_v15  ;;  %v347_v30 = vand.u32 127, %v337_v3 }
  0x3e   : > { %586 = vlog2.f32 %v390_v17  ;;  %vm372_vm7 = vcmp.gt.f32.partialorder %v368_v26, 0.0  ;;  %v343_v31 = vmul.u32 128, %v339_v22  ;;  %v385_v33 = vsel %vm369_vm4, %v381_v11, %v373_v4 }
  0x3f   : > { %588 = vlog2.f32 %v391_v27  ;;  %v392_v32 = vsel %vm372_vm7, %v376_v24, %v384_v28  ;;  %v340_v34 = vadd.s32 16, %v338_v15  ;;  %v386_v35 = vsel %vm370_vm5, %v382_v12, %v374_v9 }
  0x40   : > { %590 = vlog2.f32 %v392_v32  ;;  %v348_v37 = vadd.s32 %v347_v30, %v342_v29  ;;  %v341_v38 = vadd.s32 24, %v338_v15  ;;  %v349_v40 = vadd.s32 %v347_v30, %v343_v31 }
  0x41   : > { %v393_v41 = vmul.f32 %v385_v33, %v385_v33  ;;  %v415_v43 = vstv %s414_s29  ;;  %v394_v44 = vmul.f32 %v386_v35, %v386_v35  ;;  %v344_v46 = vmul.u32 128, %v340_v34 }
  0x42   : > { %vm416_vm8 = vcmp.lt.s32.totalorder %v348_v37, %v415_v43  ;;  %v387_v49 = vsel %vm371_vm6, %v383_v23, %v375_v19  ;;  %v345_v50 = vmul.u32 128, %v341_v38  ;;  %vm417_vm9 = vcmp.lt.s32.totalorder %v349_v40, %v415_v43 }
  0x43   : > { %v350_v56 = vadd.s32 %v347_v30, %v344_v46  ;;  %v388_v57 = vsel %vm372_vm7, %v384_v28, %v376_v24  ;;  %v395_v61 = vmul.f32 %v387_v49, %v387_v49 }
  0x44   : > { %v351_v2 = vadd.s32 %v347_v30, %v345_v50  ;;  %v396_v5 = vmul.f32 %v388_v57, %v388_v57 }
  0x45   : > { %vm418_vm10 = vcmp.lt.s32.totalorder %v350_v56, %v415_v43 }
  0x46   : > { %vm419_vm11 = vcmp.lt.s32.totalorder %v351_v2, %v415_v43 }
  0x47   : > { %v585_v36 = vpop.eup %584 }
  0x48   : > { %v587_v39 = vpop.eup %586  ;;  %v398_v42 = vmul.f32 0.6931472, %v585_v36 }
  0x49   : > { %v400_v45 = vmul.f32 0.6931472, %v587_v39  ;;  %v589_v53 = vpop.eup %588 }
  0x4a   : > { %v406_v47 = vmul.f32 1.442695, %v398_v42  ;;  %v402_v62 = vmul.f32 0.6931472, %v589_v53  ;;  %v591_v63 = vpop.eup %590 }
  0x4b   : > { %v407_v48 = vmul.f32 1.442695, %v400_v45  ;;  %v404_v6 = vmul.f32 0.6931472, %v591_v63 }
  0x4c   : > { %v410_v51 = vmul.f32 %v406_v47, %v393_v41  ;;  %v408_v4 = vmul.f32 1.442695, %v402_v62 }
  0x4d   : > { %v411_v54 = vmul.f32 %v407_v48, %v394_v44  ;;  %v409_v8 = vmul.f32 1.442695, %v404_v6 }
  0x4e   : > { %v420_v58 = vsel %vm416_vm8, %v410_v51, 0.0  ;;  %v412_v7 = vmul.f32 %v408_v4, %v395_v61 }
  0x4f   : > { %v421_v0 = vsel %vm417_vm9, %v411_v54, 0.0  ;;  %v432_v1 = vadd.f32 %v424_v52, %v420_v58  ;;  %v413_v10 = vmul.f32 %v409_v8, %v396_v5 }
  0x50   : > { %v433_v3 = vadd.f32 %v425_v55, %v421_v0  ;;  %v422_v9 = vsel %vm418_vm10, %v412_v7, 0.0 }
  0x51   : > { %436 = vst [vmem:[%s660_s19] sm:$0xff] %v432_v1  ;;  %v434_v11 = vadd.f32 %v426_v59, %v422_v9  ;;  %v423_v12 = vsel %vm419_vm11, %v413_v10, 0.0 }
  0x52   : > { %437 = vst [vmem:[%s660_s19 + $0x8] sm:$0xff] %v433_v3  ;;  %v435_v13 = vadd.f32 %v427_v60, %v423_v12 }
  0x53   : > { %438 = vst [vmem:[%s660_s19 + $0x10] sm:$0xff] %v434_v11 }
  0x54   : > { %439 = vst [vmem:[%s660_s19 + $0x18] sm:$0xff] %v435_v13 }
  0x55 PF: > { %s12_s11 = sadd.s32 1, %s614_s11   ;;  %s732_s9 = smov %s610_s10 }
  0x56   : > { %p9_p8 = scmp.ge.s32.totalorder %s12_s11, 4   ;;  %s733_s10 = smov %s735_s12 }
  0x58   :  { %11 = sbr.rel (!%p9_p8) target bundleno = 2 (0x2), region = 73 }

</bundles_post_ra>
